<compile_context>
chip_gen: v5e
topology: v5e:2x2
jax: 0.10.0
libtpu: 0.0.40
codegen_flags: <defaults>
</compile_context>

<pallas_src>
import jax
import jax.numpy as jnp
from jax.experimental import pallas as pl
from jax.experimental.pallas import tpu as pltpu


EPS = 1e-10


def _round_up(x: int, m: int) -> int:
    return ((x + m - 1) // m) * m


def _cdiv(a: int, b: int) -> int:
    return -(-a // b)


def _choose_tile_hw(C: int, HW: int, N: int) -> int:
    """Pick a 128-multiple lane tile width for the spatial axis."""
    # Target ~1 MiB of f32 per block (C * thw * 4B); small blocks leave the
    # ~0.35us per-grid-step overhead dominant, bigger blocks have diminishing
    # returns past ~1 MiB.
    target_bytes = 1 << 20
    thw = max(128, _round_up(max(1, target_bytes // (C * 4)), 128))

    # VMEM bound (portable to v7x's 64 MiB physical / 32 MiB scoped default):
    # double-buffered f32 in+out ~ 4 * C * thw * 4B; keep C*thw <= ~1.5M elems.
    max_elems = 3 * (1 << 19)  # 1.5M
    max_thw = max(128, (max_elems // C) // 128 * 128)
    thw = min(thw, max_thw)

    # Don't exceed the (128-rounded) spatial extent.
    hw128 = _round_up(HW, 128)
    thw = min(thw, hw128)

    # Batch-1: make sure both v7x TensorCores get spatial tiles (>= 2 tiles,
    # nudged to an even count when that is achievable by shrinking the tile).
    if N == 1 and HW > 128:
        n_tiles = _cdiv(HW, thw)
        if n_tiles < 2:
            thw = max(128, _round_up(_cdiv(HW, 2), 128))
        elif n_tiles % 2 == 1:
            thw2 = max(128, _round_up(_cdiv(HW, n_tiles + 1), 128))
            if _cdiv(HW, thw2) % 2 == 0:
                thw = thw2
    return thw


def _l2norm_kernel(x_ref, w_ref, o_ref):
    # x_ref: (1, C, THW) tile; w_ref: (1, C, 1) f32 scale (constant block index,
    # so Pallas only DMAs it once); o_ref: (1, C, THW).
    x = x_ref[...].astype(jnp.float32)
    # Channel (sublane-axis) reduction, keepdims for lane-wise broadcast.
    sq_sum = jnp.sum(x * x, axis=1, keepdims=True)      # (1, 1, THW)
    norm = jnp.sqrt(sq_sum) + EPS                        # (1, 1, THW)
    # One exact reciprocal per lane + C multiplies instead of C divides.
    inv = pl.reciprocal(norm)
    out = w_ref[...] * (x * inv)                         # (1,C,1)*(1,C,THW)
    o_ref[...] = out.astype(o_ref.dtype)


def l2norm_pallas(x_nchw: jax.Array, weight: jax.Array) -> jax.Array:
    """L2Norm forward. x_nchw: (N, C, H, W); weight: (C,). Returns (N, C, H, W)."""
    N, C, H, W = x_nchw.shape
    HW = H * W

    thw = _choose_tile_hw(C, HW, N)
    grid = (N, _cdiv(HW, thw))

    # No wrapper-side padding: Pallas handles the partial final spatial block
    # (OOB lanes read unspecified data but their outputs are masked on store;
    # the channel-only reduction cannot mix them into valid lanes).
    x3 = x_nchw.reshape(N, C, HW)
    w3 = weight.reshape(1, C, 1).astype(jnp.float32)   # keep weight precision

    out3 = pl.pallas_call(
        _l2norm_kernel,
        out_shape=jax.ShapeDtypeStruct((N, C, HW), x_nchw.dtype),
        grid_spec=pltpu.PrefetchScalarGridSpec(
            num_scalar_prefetch=0,
            grid=grid,
            in_specs=[
                pl.BlockSpec((1, C, thw), lambda n, t: (n, 0, t)),
                pl.BlockSpec((1, C, 1), lambda n, t: (0, 0, 0)),
            ],
            out_specs=pl.BlockSpec((1, C, thw), lambda n, t: (n, 0, t)),
        ),
        compiler_params=pltpu.CompilerParams(
            # Both axes independent -> megacore-shardable on v7x.
            dimension_semantics=("parallel", "parallel"),
            # Conservative budget; tile selection above keeps blocks well
            # inside this even on v7x's 64 MiB VMEM.
            vmem_limit_bytes=32 * 1024 * 1024,
        ),
    )(x3, w3)

    return out3.reshape(N, C, H, W)


def l2norm_reference(x_nchw: jax.Array, weight: jax.Array) -> jax.Array:
    """Pure-JAX reference matching the PyTorch module exactly."""
    xf = x_nchw.astype(jnp.float32)
    norm = jnp.sqrt(jnp.sum(xf * xf, axis=1, keepdims=True)) + EPS
    out = weight.reshape(1, -1, 1, 1).astype(jnp.float32) * (xf / norm)
    return out.astype(x_nchw.dtype)


if __name__ == "__main__":
    # Small shapes consistent with the module: batch=2, channels=4, spatial=16x16
    N, C, H, W = 2, 4, 16, 16
    scale = 20.0  # L2Norm(n_channels, scale); reset_parameters() fills weight with `scale`

    key = jax.random.PRNGKey(0)
    x = jax.random.normal(key, (N, C, H, W), dtype=jnp.float32)
    weight = jnp.full((C,), scale, dtype=jnp.float32)  # deterministic init (constant_)

    out = l2norm_pallas(x, weight)
    out = jax.block_until_ready(out)

    ref = l2norm_reference(x, weight)
    assert out.shape == (N, C, H, W)
    assert out.dtype == x.dtype
    assert jnp.allclose(out, ref, rtol=1e-5, atol=1e-5), "mismatch vs reference"

    # Non-128-multiple spatial size, batch 1 (partial last block + even-tile
    # megacore path), SSD-like 38x38.
    N2, C2, H2, W2 = 1, 32, 38, 38
    x2 = jax.random.normal(jax.random.PRNGKey(1), (N2, C2, H2, W2), dtype=jnp.float32)
    w2 = jnp.full((C2,), scale, dtype=jnp.float32)
    out2 = jax.block_until_ready(l2norm_pallas(x2, w2))
    assert jnp.allclose(out2, l2norm_reference(x2, w2), rtol=1e-5, atol=1e-5), \
        "partial-block path mismatch"

    print("KERNEL_OK")
</pallas_src>

<mosaic_0001>
module attributes {stable_mosaic.version = 11 : i64} {
  func.func @_l2norm_kernel(%arg0: i32, %arg1: i32, %arg2: memref<1x4x256xf32, #tpu.memory_space<vmem>>, %arg3: memref<1x4x1xf32, #tpu.memory_space<vmem>>, %arg4: memref<1x4x256xf32, #tpu.memory_space<vmem>>) attributes {dimension_semantics = [#tpu.dimension_semantics<parallel>, #tpu.dimension_semantics<parallel>], iteration_bounds = array<i64: 2, 1>, scalar_prefetch = 0 : i64, scratch_operands = 0 : i64, tpu.core_type = #tpu.core_type<tc>, window_params = [{transform_indices = @transform_0, window_bounds = array<i64: 1, 4, 256>}, {pipeline_mode = #tpu.pipeline_mode<synchronous>, transform_indices = @transform_1, window_bounds = array<i64: 1, 4, 1>}, {transform_indices = @transform_2, window_bounds = array<i64: 1, 4, 256>}]} {
    %c0 = arith.constant 0 : index
    %c0_0 = arith.constant 0 : index
    %c0_1 = arith.constant 0 : index
    %0 = vector.load %arg2[%c0, %c0_0, %c0_1] : memref<1x4x256xf32, #tpu.memory_space<vmem>>, vector<1x4x256xf32>
    %1 = arith.mulf %0, %0 : vector<1x4x256xf32>
    %cst = arith.constant dense<0.000000e+00> : vector<1x256xf32>
    %2 = vector.multi_reduction <add>, %1, %cst [1] : vector<1x4x256xf32> to vector<1x256xf32>
    %3 = vector.shape_cast %2 : vector<1x256xf32> to vector<1x1x256xf32>
    %4 = math.sqrt %3 : vector<1x1x256xf32>
    %cst_2 = arith.constant 1.000000e-10 : f32
    %5 = vector.broadcast %cst_2 : f32 to vector<1x1x256xf32>
    %6 = arith.addf %4, %5 : vector<1x1x256xf32>
    %7 = tpu.reciprocal %6 : vector<1x1x256xf32> -> vector<1x1x256xf32>
    %c0_3 = arith.constant 0 : index
    %c0_4 = arith.constant 0 : index
    %c0_5 = arith.constant 0 : index
    %8 = vector.load %arg3[%c0_3, %c0_4, %c0_5] : memref<1x4x1xf32, #tpu.memory_space<vmem>>, vector<1x4x1xf32>
    %9 = vector.broadcast %7 : vector<1x1x256xf32> to vector<1x4x256xf32>
    %10 = arith.mulf %0, %9 : vector<1x4x256xf32>
    %11 = vector.broadcast %8 : vector<1x4x1xf32> to vector<1x4x256xf32>
    %12 = arith.mulf %11, %10 : vector<1x4x256xf32>
    %c0_6 = arith.constant 0 : index
    %c0_7 = arith.constant 0 : index
    %c0_8 = arith.constant 0 : index
    %13 = vector.load %arg4[%c0_6, %c0_7, %c0_8] : memref<1x4x256xf32, #tpu.memory_space<vmem>>, vector<1x4x256xf32>
    tpu.vector_store %arg4[%c0_6, %c0_7, %c0_8], %12 {strides = array<i32>} : memref<1x4x256xf32, #tpu.memory_space<vmem>>, vector<1x4x256xf32>,
    return
  }
  func.func @transform_0(%arg0: i32, %arg1: i32) -> (i32, i32, i32) {
    %c0_i32 = arith.constant 0 : i32
    %c0_i32_0 = arith.constant 0 : i32
    return %arg0, %c0_i32, %arg1 : i32, i32, i32
  }
  func.func @transform_1(%arg0: i32, %arg1: i32) -> (i32, i32, i32) {
    %c0_i32 = arith.constant 0 : i32
    %c0_i32_0 = arith.constant 0 : i32
    %c0_i32_1 = arith.constant 0 : i32
    %c0_i32_2 = arith.constant 0 : i32
    return %c0_i32, %c0_i32_0, %c0_i32_1 : i32, i32, i32
  }
  func.func @transform_2(%arg0: i32, %arg1: i32) -> (i32, i32, i32) {
    %c0_i32 = arith.constant 0 : i32
    %c0_i32_0 = arith.constant 0 : i32
    return %arg0, %c0_i32, %arg1 : i32, i32, i32
  }
}

</mosaic_0001>

<bundles_post_ra>
// kernel: tpu_custom_call.1
= control target key start
LH: loop header
LB: loop body
LE: loop exit
PB: predicated region body
PF: predicated region fallthrough
CT: control target
= control target key end

     0   :  { %7 = vsyncpa [#allocation3], 0  ;;  %s743_s0 = inlined_call_operand.hbm [shape: f32[2,4,256], index: 0, kind: input, shape index: {}]   ;;  %s744_s1 = inlined_call_operand.vmem [shape: f32[1,4,1], index: 1, kind: input, shape index: {}]   ;;  %s745_s2 = inlined_call_operand.hbm [shape: f32[2,4,256], index: 2, kind: output, shape index: {}]  }
   0x1   :  { %9 = vsyncpa [#allocation3 + $0x1], 0 }
   0x2   :  { %10 = vsyncpa [#allocation4], 0 }
   0x3   :  { %12 = vsyncpa [#allocation4 + $0x1], 0  ;;  %s607_s9 = smov 0   ;;  %s609_s10 = smov 0  }
   0x4   :  { %s611_s11 = smov 0   ;;  %s613_s12 = smov 0  }
   0x5   :  { %s615_s13 = smov 0   ;;  %s617_s14 = smov 0  }
   0x6 LB: > { %s388_s15 = sadd.s32 4294967295, %s589_s14   ;;  %s389_s16 = sadd.s32 4294967294, %s589_s14   ;;  %s589_s14 = sphi %s617_s14, %s18_s14   ;;  %s585_s13 = sphi %s615_s13, %s754_s13   ;;  %s581_s12 = sphi %s613_s12, %s753_s12   ;;  %s577_s11 = sphi %s611_s11, %s752_s11   ;;  %s573_s10 = sphi %s609_s10, %s751_s10   ;;  %s569_s9 = sphi %s607_s9, %s750_s9  }
   0x7   : > { %s30_s17 = sadd.s32 1, %s585_s13  ;;  %s39_s18 = sadd.s32 1, %s577_s11 }
   0x8   : > { %p32_p0 = scmp.ge.s32.totalorder %s30_s17, 2  ;;  %p46_p1 = scmp.ne.s32.totalorder %s577_s11, %s573_s10 }
   0x9   : > { %p47_p2 = scmp.eq.s32.totalorder %s589_s14, 0  ;;  %p52_p3 = scmp.ne.s32.totalorder %s573_s10, %s569_s9 }
   0xa   : > { %s756_s17 = smov (%p32_p0, %s30_s17), 0  ;;  %p53_p5 = scmp.eq.s32.totalorder %s388_s15, 0 }
   0xb   : > { %p648_p4 = por %p47_p2, %p46_p1  ;;  %s34_s20 = ssub.s32 %s585_s13, %s756_s17 }
   0xc   : > { %p99_p6 = scmp.eq.s32.totalorder %s388_s15, 1  ;;  %p37_p7 = scmp.eq.s32.totalorder %s34_s20, 0 }
   0xd   : > { %p654_p8 = por %p53_p5, %p52_p3  ;;  %p105_p10 = scmp.eq.s32.totalorder %s389_s16, 1 }
   0xe   : > { %p658_p9 = por %p99_p6, %p46_p1  ;;  %p391_p12 = scmp.ge.s32.totalorder %s589_s14, 2 }
   0xf   : > { %s663_s23 = scalar_select %p37_p7, %s577_s11, %s39_s18  }
  0x10   : > { %p665_p11 = por %p105_p10, %p52_p3  ;;  %p417_p13 = scmp.lt.s32.totalorder %s589_s14, 2 }
  0x11   : > { %s128_s25 = sand.u32 1, %s577_s11   ;;  %s403_s27 = sshll.u32 %s585_s13, 3 }
  0x12   : > { %s392_s26 = sshll.u32 %s128_s25, 3  ;;  %s139_s30 = scalar_lea.hbm %s743_s0, %s403_s27 }
  0x13   : > { %s132_s3 = scalar_lea.vmem [#allocation2], %s392_s26  ;;  %s141_s5 = sshll.u32 %s139_s30, 4  ;;  %s142_s5 = int_to_ptr.hbm [resolvable:$true] %s141_s5 }
  0x14   : > { %s143_s4 = sshll.u32 %s132_s3, 4  ;;  %p410_p0 = pnand %p417_p13, %p648_p4  ;;  %s144_s4 = int_to_ptr.vmem [resolvable:$true] %s143_s4 }
  0x15   : > { %p395_p1 = scmp.ge.s32.totalorder %s589_s14, 1  ;;  %p148_p2 = scmp.lt.s32.totalorder %s589_s14, 3 }
  0x16   : > { %s129_s6 = scalar_lea.sflag [#allocation3], %s128_s25 }
  0x17   : > { %412 = dma.hbm_to_vmem [thread:$0]  (!%p410_p0), %s142_s5, 128, %s144_s4, %s129_s6  }
  0x18   : > { %p149_p3 = pnand %p395_p1, %p148_p2 }
  0x19   : > { %s681_s7 = sand.u32 (!%p149_p3), 1, %s573_s10  }
  0x1a   : > { %152 = sbr.rel (%p149_p3) target bundleno = 157 (0x9d), region = 28  ;;  %s396_s8 = sshll.u32 (!%p149_p3), %s681_s7, 3 }
  0x1b   : > { %s155_s15 = scalar_lea.sflag (!%p149_p3), [#allocation3], %s681_s7  ;;  %s158_s16 = scalar_lea.vmem (!%p149_p3), [#allocation2], %s396_s8 }
  0x1f   : > { %560 = dma.done.wait (%p654_p8), %s155_s15, 128  }
  0x20   : > { %562 = vsyncadd (%p654_p8), %s155_s15, 4294967168  ;;  %v591_v0 = vmov 0   ;;  %v259_v1 = vld [vmem:[%s744_s1] sm:$0xf]  ;;  %v694_v2 = vld [vmem:[%s158_s16] sm:$0xff]  ;;  %vm190_vm0 = vcmask 1043456  }
  0x21   : > { %468 = vset.pattern.permute.xlu0 %v591_v0  ;;  %v183_v3 = vmul.f32 %v694_v2, %v694_v2  ;;  %s404_s20 = sshll.u32 %s581_s12, 3  ;;  %s179_s27 = scalar_lea.vmem [#allocation5], %s396_s8 }
  0x22   : > { %268 = vperm.xlu0 %468, %v259_v1   ;;  %s299_s26 = scalar_lea.hbm %s745_s2, %s404_s20  ;;  %s301_s28 = sshll.u32 %s179_s27, 4  ;;  %s302_s28 = int_to_ptr.vmem [resolvable:$true] %s301_s28 }
  0x23   : > { %185 = vst [vmem:[#allocation1] ss:$2 sm:$0xff] %v183_v3  ;;  %s303_s29 = sshll.u32 %s299_s26, 4  ;;  %s286_s12 = scalar_lea.sflag [#allocation4], %s681_s7  ;;  %s304_s29 = int_to_ptr.hbm [resolvable:$true] %s303_s29 }
  0x24   : > { %s521_s30 = sshra.s32 %s304_s29, 4  ;;  %s527_s6 = scalar_lea.hbm %s745_s2, 16  ;;  %s522_s30 = int_to_ptr.hbm [resolvable:$true] %s521_s30 }
  0x25   : > { %s523_s3 = scalar_lea.hbm %s522_s30, 8  ;;  %p528_p7 = scmp.lt.s32.totalorder %s522_s30, %s745_s2 }
  0x26   : > { %p524_p4 = scmp.ne.s32.totalorder %s522_s30, %s523_s3  ;;  %p529_p8 = scmp.lt.s32.totalorder %s527_s6, %s523_s3 }
  0x28   : > { %p525_p5 = pnand %p524_p4, %p658_p9  ;;  %p530_p10 = por %p529_p8, %p528_p7 }
  0x2a   : > { %v187_v4 = vld.sshfl [vmem:[#allocation1 + $0x8] sm:$0xff pattern:$0x75316420]  ;;  %v186_v6 = vld.sshfl [vmem:[#allocation1] sm:$0xff pattern:$0x75316420]  ;;  %p526_p6 = pneg %p525_p5 }
  0x2b   : > { %v198_v5 = vsel %vm190_vm0, %v187_v4, 0.0  ;;  %v191_v8 = vsel %vm190_vm0, %v186_v6, 0.0 }
  0x2c   : > { %v199_v7 = vrot.slane %v198_v5, 4  ;;  %v192_v9 = vrot.slane %v191_v8, 4  ;;  %p531_p13 = pnand %p530_p10, %p526_p6 }
  0x2e   : > { %v200_v10 = vadd.f32 %v199_v7, %v198_v5  ;;  %v193_v11 = vadd.f32 %v192_v9, %v191_v8 }
  0x30   : > { %v201_v12 = vrot.slane %v200_v10, 2  ;;  %v194_v13 = vrot.slane %v193_v11, 2 }
  0x32   : > { %v202_v14 = vadd.f32 %v201_v12, %v200_v10  ;;  %v195_v15 = vadd.f32 %v194_v13, %v193_v11 }
  0x34   : > { %v203_v16 = vrot.slane %v202_v14, 1  ;;  %v196_v17 = vrot.slane %v195_v15, 1 }
  0x36   : > { %v204_v18 = vadd.f32 %v203_v16, %v202_v14  ;;  %v197_v19 = vadd.f32 %v196_v17, %v195_v15 }
  0x38   : > { %469 = vrsqrt.f32 %v204_v18  ;;  %vm224_vm1 = vcmp.eq.f32.partialorder %v204_v18, inf  ;;  %v227_v33 = vand.u32 2147483648, %v204_v18  ;;  %vm226_vm2 = vcmp.eq.f32.partialorder %v204_v18, 0.0 }
  0x39   : > { %471 = vrsqrt.f32 %v197_v19  ;;  %vm212_vm3 = vcmp.eq.f32.partialorder %v197_v19, inf  ;;  %v215_v36 = vand.u32 2147483648, %v197_v19  ;;  %vm214_vm4 = vcmp.eq.f32.partialorder %v197_v19, 0.0 }
  0x3e   : > { %v470_v20 = vpop.eup %469 }
  0x3f   : > { %v218_v21 = vmul.f32 %v470_v20, %v204_v18  ;;  %v472_v22 = vpop.eup %471 }
  0x40   : > { %v206_v23 = vmul.f32 %v472_v22, %v197_v19 }
  0x41   : > { %v219_v24 = vmul.f32 %v470_v20, %v218_v21 }
  0x42   : > { %v207_v25 = vmul.f32 %v472_v22, %v206_v23 }
  0x43   : > { %v220_v26 = vmul.f32 0.5, %v219_v24 }
  0x44   : > { %v208_v27 = vmul.f32 0.5, %v207_v25 }
  0x45   : > { %v221_v28 = vsub.f32 1.5, %v220_v26 }
  0x46   : > { %v209_v29 = vsub.f32 1.5, %v208_v27 }
  0x47   : > { %v222_v30 = vmul.f32 %v470_v20, %v221_v28 }
  0x48   : > { %v210_v31 = vmul.f32 %v472_v22, %v209_v29 }
  0x49   : > { %v223_v32 = vmul.f32 %v222_v30, %v204_v18 }
  0x4a   : > { %v211_v34 = vmul.f32 %v210_v31, %v197_v19 }
  0x4b   : > { %v225_v35 = vsel %vm224_vm1, %v204_v18, %v223_v32 }
  0x4c   : > { %v228_v37 = vsel %vm226_vm2, %v227_v33, %v225_v35  ;;  %v213_v38 = vsel %vm212_vm3, %v197_v19, %v211_v34 }
  0x4d   : > { %v230_v39 = vadd.f32 1e-10, %v228_v37  ;;  %v216_v40 = vsel %vm214_vm4, %v215_v36, %v213_v38 }
  0x4e   : > { %v229_v41 = vadd.f32 1e-10, %v216_v40 }
  0x4f   : > { %473 = vrcp.f32 %v230_v39  ;;  %v256_v49 = vand.u32 2147483648, %v230_v39  ;;  %vm250_vm5 = vweird.f32 %v230_v39  ;;  %v254_v53 = vand.u32 2147483647, %v230_v39 }
  0x50   : > { %475 = vrcp.f32 %v229_v41  ;;  %v242_v52 = vand.u32 2147483648, %v229_v41  ;;  %vm236_vm8 = vweird.f32 %v229_v41  ;;  %v240_v56 = vand.u32 2147483647, %v229_v41 }
  0x51   : > { %v257_v54 = vor.u32 1.1754944e-38, %v256_v49  ;;  %vm255_vm11 = vcmp.eq.f32.partialorder %v254_v53, 8.507059e+37 }
  0x52   : > { %v243_v57 = vor.u32 1.1754944e-38, %v242_v52  ;;  %vm241_vm12 = vcmp.eq.f32.partialorder %v240_v56, 8.507059e+37 }
  0x55   : > { %v474_v42 = vpop.eup %473 }
  0x56   : > { %v246_v43 = vmul.f32 %v474_v42, %v230_v39  ;;  %v476_v44 = vpop.eup %475  ;;  %vm251_vm6 = vweird.f32 %v474_v42 }
  0x57   : > { %v232_v45 = vmul.f32 %v476_v44, %v229_v41  ;;  %vm252_vm7 = vmor %vm250_vm5, %vm251_vm6  ;;  %vm237_vm9 = vweird.f32 %v476_v44 }
  0x58   : > { %v247_v46 = vsub.f32 1.0, %v246_v43  ;;  %vm238_vm10 = vmor %vm236_vm8, %vm237_vm9 }
  0x59   : > { %v233_v47 = vsub.f32 1.0, %v232_v45 }
  0x5a   : > { %v248_v48 = vmul.f32 %v474_v42, %v247_v46 }
  0x5b   : > { %v234_v50 = vmul.f32 %v476_v44, %v233_v47 }
  0x5c   : > { %v249_v51 = vadd.f32 %v474_v42, %v248_v48 }
  0x5d   : > { %v235_v55 = vadd.f32 %v476_v44, %v234_v50 }
  0x5e   : > { %v253_v58 = vsel %vm252_vm7, %v474_v42, %v249_v51 }
  0x5f   : > { %v239_v59 = vsel %vm238_vm10, %v476_v44, %v235_v55  ;;  %v258_v60 = vsel %vm255_vm11, %v257_v54, %v253_v58 }
  0x60   : > { %v244_v61 = vsel %vm241_vm12, %v243_v57, %v239_v59  ;;  %v262_v62 = vrot.slane %v258_v60, 4 }
  0x62   : > { %v263_v63 = vsel %vm190_vm0, %v244_v61, %v262_v62 }
  0x63   : > { %v265_v0 = vmul.f32 %v263_v63, %v694_v2 }
  0x65   : > { %272 = vst [vmem:[#allocation1] ss:$2 sm:$0xff] %v265_v0 }
  0x6c   : > { %v274_v1 = vld.sshfl [vmem:[#allocation1 + $0x8] sm:$0xff pattern:$0x75316420]  ;;  %v273_v4 = vld.sshfl [vmem:[#allocation1] sm:$0xff pattern:$0x75316420] }
  0x94   : > { %v269_v3 = vpop.permute.xlu0 %268 }
  0x95   : > { %v278_v5 = vmul.f32 %v274_v1, %v269_v3  ;;  %v277_v6 = vmul.f32 %v273_v4, %v269_v3 }
  0x97   : > { %v281_v7 = vrot.slane %v278_v5, 4 }
  0x99   : > { %v282_v2 = vsel %vm190_vm0, %v277_v6, %v281_v7 }
  0x9a   : > { %284 = vst [vmem:[%s179_s27] sm:$0xff] %v282_v2 }
  0x9b   : > { %534 = shalt.err (!%p531_p13)
}
  0x9c   : > { %407 = dma.vmem_to_hbm [thread:$0]  (%p658_p9), %s302_s28, 128, %s304_s29, %s286_s12  }
  0x9d PF: > { %s315_s7 = sand.u32 1, %s569_s9   ;;  %p414_p0 = pnand %p391_p12, %p665_p11 }
  0x9e   : > { %s316_s16 = scalar_lea.sflag [#allocation4], %s315_s7 }
  0x9f   : > { %p415_p1 = pneg %p414_p0 }
  0xa1   : > { %564 = dma.done.wait (%p415_p1), %s316_s16, 128  }
  0xa2   : > { %566 = vsyncadd (%p415_p1), %s316_s16, 4294967168  ;;  %s18_s14 = sadd.s32 1, %s589_s14   ;;  %s750_s9 = smov %s573_s10 }
  0xa3   : > { %p15_p2 = scmp.ge.s32.totalorder %s18_s14, 4   ;;  %s751_s10 = smov %s577_s11 }
  0xa4   : > { %s752_s11 = smov %s663_s23  ;;  %s753_s12 = smov %s585_s13 }
  0xa5   : > { %s754_s13 = smov %s756_s17  ;;  %17 = sbr.rel (!%p15_p2) target bundleno = 6 (0x6), region = 73 }
  0xaa   :  { %322 = vsyncpa [#allocation3], 1 }
  0xab   :  { %324 = vsyncpa [#allocation3 + $0x1], 1 }
  0xac   :  { %325 = vsyncpa [#allocation4], 1 }
  0xad   :  { %327 = vsyncpa [#allocation4 + $0x1], 1 }

</bundles_post_ra>
